<compile_context>
chip_gen: v6e
topology: v6e:2x2x1
jax: 0.10.0
libtpu: 0.0.40
codegen_flags: <defaults>
</compile_context>

<pallas_src>
import functools

import jax
import jax.numpy as jnp
from jax.experimental import pallas as pl
from jax.experimental.pallas import tpu as pltpu

KERNEL_SIZE = 25  # matches the PyTorch Model (kernel_size = 25)


# --------------------------------------------------------------------------
# Main fused kernel: effective-weight matmul + bias + SSE reduction
# --------------------------------------------------------------------------
def dlinear_kernel(w_ref, x_ref, b_ref, y_ref, out_ref, sse_ref):
    # w_ref : (P, Lpad)    effective weight (decomposition folded in)
    # x_ref : (Lpad, B*C)  edge-padded series, batch*channel packed into lanes
    # b_ref : (P, 1)       combined bias (bs + bt)
    # y_ref : (P, B*C)     target, same packed layout as the output
    # out_ref: (P, B*C)    prediction
    # sse_ref: (1, 1)      sum of squared errors over the whole batch
    out = (jnp.dot(w_ref[...], x_ref[...], preferred_element_type=jnp.float32)
           + b_ref[...])                                      # (P, B*C)
    out_ref[...] = out.astype(out_ref.dtype)

    diff = out - y_ref[...].astype(jnp.float32)
    sse_ref[...] = jnp.sum(diff * diff).reshape(1, 1)


def dlinear_forward(x, y, ws, wt, bs, bt, *, kernel_size=KERNEL_SIZE):
    """x: (B, L, C), y: (B, P, C).  Returns (pred (B,P,C), mse scalar)."""
    B, L, C = x.shape
    P = ws.shape[0]
    pad = (kernel_size - 1) // 2
    Lpad = L + kernel_size - 1

    # Edge padding (repeat first / last time step) — glue, stays in JAX.
    xpad = jnp.concatenate(
        [jnp.repeat(x[:, :1, :], pad, axis=1),
         x,
         jnp.repeat(x[:, -1:, :], pad, axis=1)], axis=1)      # (B, Lpad, C)
    # Pack batch*channel into the lane dimension -> single matmul, no grid.
    xpad_flat = xpad.transpose(1, 0, 2).reshape(Lpad, B * C)  # (Lpad, B*C)

    # Fold the moving-average decomposition into the weights (param glue):
    #   trend    = A @ xpad     (AvgPool1d, kernel=k, stride=1, no padding)
    #   seasonal = (S - A) @ xpad
    rows = jnp.arange(L)[:, None]
    cols = jnp.arange(Lpad)[None, :]
    A = ((cols >= rows) & (cols < rows + kernel_size)).astype(jnp.float32)
    A = A / float(kernel_size)                                # (L, Lpad)
    S = (cols == rows + pad).astype(jnp.float32)              # (L, Lpad)
    W_eff = ws @ (S - A) + wt @ A                             # (P, Lpad)
    b_eff = (bs + bt).reshape(P, 1)                           # (P, 1)

    y_flat = y.transpose(1, 0, 2).reshape(P, B * C).astype(jnp.float32)

    out_flat, sse = pl.pallas_call(
        dlinear_kernel,
        out_shape=(jax.ShapeDtypeStruct((P, B * C), x.dtype),
                   jax.ShapeDtypeStruct((1, 1), jnp.float32)),
    )(W_eff.astype(jnp.float32), xpad_flat.astype(jnp.float32),
      b_eff.astype(jnp.float32), y_flat)

    pred = out_flat.reshape(P, B, C).transpose(1, 0, 2)       # (B, P, C)
    mse = sse[0, 0] / float(B * P * C)
    return pred, mse


# --------------------------------------------------------------------------
# KL divergence kernel — ONE launch over all four (mu, log_sigma) pairs
# --------------------------------------------------------------------------
def kl_kernel(mu_ref, ls_ref, out_ref, *, prior_mu, prior_sigma):
    mu = mu_ref[...]
    ls = ls_ref[...]
    sigma = jnp.exp(ls)
    # Same expression as the PyTorch reference (_kl_divergence), including
    # its "+ log_sigma - log(prior_sigma)" term.
    kl = ((sigma ** 2 + (mu - prior_mu) ** 2) / (2.0 * prior_sigma ** 2)
          - 0.5 + ls - jnp.log(jnp.float32(prior_sigma)))
    out_ref[...] = jnp.sum(kl).reshape(1, 1)


def kl_loss_all(pairs, prior_mu=0.0, prior_sigma=1.0):
    """pairs: list of (mu, log_sigma) arrays. Single fused reduction."""
    mu_all = jnp.concatenate([m.reshape(-1) for m, _ in pairs]).reshape(1, -1)
    ls_all = jnp.concatenate([l.reshape(-1) for _, l in pairs]).reshape(1, -1)
    kern = functools.partial(kl_kernel, prior_mu=float(prior_mu),
                             prior_sigma=float(prior_sigma))
    out = pl.pallas_call(
        kern,
        out_shape=jax.ShapeDtypeStruct((1, 1), jnp.float32),
    )(mu_all.astype(jnp.float32), ls_all.astype(jnp.float32))
    return out[0, 0]


# --------------------------------------------------------------------------
# Full model (individual = False branch of the PyTorch Model)
# --------------------------------------------------------------------------
def model_forward(x, y, params, sample_key):
    """Returns (prediction, mse, kl_total) like Model.forward."""
    k1, k2, k3, k4 = jax.random.split(sample_key, 4)

    def sample(mu, log_sigma, key):
        return mu + jnp.exp(log_sigma) * jax.random.normal(key, mu.shape,
                                                           dtype=mu.dtype)

    ws = sample(params["s_w_mu"], params["s_w_ls"], k1)
    bs = sample(params["s_b_mu"], params["s_b_ls"], k2)
    wt = sample(params["t_w_mu"], params["t_w_ls"], k3)
    bt = sample(params["t_b_mu"], params["t_b_ls"], k4)

    pred, mse = dlinear_forward(x, y, ws, wt, bs, bt)

    kl_total = kl_loss_all([
        (params["s_w_mu"], params["s_w_ls"]),
        (params["s_b_mu"], params["s_b_ls"]),
        (params["t_w_mu"], params["t_w_ls"]),
        (params["t_b_mu"], params["t_b_ls"]),
    ])
    return pred, mse, kl_total, (ws, wt, bs, bt)


# --------------------------------------------------------------------------
# Pure-JAX reference (mirrors the PyTorch forward) for self-checking
# --------------------------------------------------------------------------
def reference_forward(x, y, ws, wt, bs, bt, params, kernel_size=KERNEL_SIZE):
    B, L, C = x.shape
    P = ws.shape[0]
    pad = (kernel_size - 1) // 2
    xpad = jnp.concatenate(
        [jnp.repeat(x[:, :1, :], pad, axis=1),
         x,
         jnp.repeat(x[:, -1:, :], pad, axis=1)], axis=1)        # (B, Lpad, C)
    # AvgPool1d over time, stride 1
    trend = jnp.stack([xpad[:, t:t + kernel_size, :].mean(axis=1)
                       for t in range(L)], axis=1)              # (B, L, C)
    seasonal = x - trend
    # permute(0,2,1) -> (B, C, L), F.linear -> (B, C, P), add, permute back
    s_out = jnp.einsum("bcl,pl->bcp", seasonal.transpose(0, 2, 1), ws) + bs
    t_out = jnp.einsum("bcl,pl->bcp", trend.transpose(0, 2, 1), wt) + bt
    pred = (s_out + t_out).transpose(0, 2, 1)                   # (B, P, C)
    mse = jnp.mean((pred - y) ** 2)

    def kl(mu, ls, prior_mu=0.0, prior_sigma=1.0):
        sigma = jnp.exp(ls)
        return jnp.sum((sigma ** 2 + (mu - prior_mu) ** 2)
                       / (2 * prior_sigma ** 2) - 0.5 + ls
                       - jnp.log(jnp.float32(prior_sigma)))

    kl_total = (kl(params["s_w_mu"], params["s_w_ls"])
                + kl(params["s_b_mu"], params["s_b_ls"])
                + kl(params["t_w_mu"], params["t_w_ls"])
                + kl(params["t_b_mu"], params["t_b_ls"]))
    return pred, mse, kl_total


def init_params(key, seq_len, pred_len):
    ks = jax.random.split(key, 4)
    return {
        "s_w_mu": 0.1 * jax.random.normal(ks[0], (pred_len, seq_len), jnp.float32),
        "s_w_ls": jnp.full((pred_len, seq_len), -3.0, jnp.float32),
        "s_b_mu": 0.1 * jax.random.normal(ks[1], (pred_len,), jnp.float32),
        "s_b_ls": jnp.full((pred_len,), -3.0, jnp.float32),
        "t_w_mu": 0.1 * jax.random.normal(ks[2], (pred_len, seq_len), jnp.float32),
        "t_w_ls": jnp.full((pred_len, seq_len), -3.0, jnp.float32),
        "t_b_mu": 0.1 * jax.random.normal(ks[3], (pred_len,), jnp.float32),
        "t_b_ls": jnp.full((pred_len,), -3.0, jnp.float32),
    }


if __name__ == "__main__":
    # configs: seq_len=8, pred_len=12, channel=4, individual=False
    B, SEQ_LEN, PRED_LEN, CHANNELS = 2, 8, 12, 4

    root = jax.random.PRNGKey(0)
    kx, ky, kp, ksample = jax.random.split(root, 4)

    x = jax.random.normal(kx, (B, SEQ_LEN, CHANNELS), jnp.float32)
    y = jax.random.normal(ky, (B, PRED_LEN, CHANNELS), jnp.float32)
    params = init_params(kp, SEQ_LEN, PRED_LEN)

    pred, mse, kl_total, sampled = model_forward(x, y, params, ksample)
    jax.block_until_ready((pred, mse, kl_total))

    assert pred.shape == (B, PRED_LEN, CHANNELS)
    assert mse.shape == () and kl_total.shape == ()

    # Self-check against a pure-JAX reference using the same sampled weights.
    ws, wt, bs, bt = sampled
    ref_pred, ref_mse, ref_kl = reference_forward(x, y, ws, wt, bs, bt, params)
    assert jnp.allclose(pred, ref_pred, rtol=2e-2, atol=2e-2)
    assert jnp.allclose(mse, ref_mse, rtol=2e-2, atol=2e-2)
    assert jnp.allclose(kl_total, ref_kl, rtol=2e-2, atol=2e-2)

    print("KERNEL_OK")
</pallas_src>

<mosaic_0001>
module attributes {stable_mosaic.version = 11 : i64} {
  func.func @dlinear_kernel(%arg0: memref<12x32xf32, #tpu.memory_space<vmem>>, %arg1: memref<32x8xf32, #tpu.memory_space<vmem>>, %arg2: memref<12x1xf32, #tpu.memory_space<vmem>>, %arg3: memref<12x8xf32, #tpu.memory_space<vmem>>, %arg4: memref<12x8xf32, #tpu.memory_space<vmem>>, %arg5: memref<1x1xf32, #tpu.memory_space<vmem>>) attributes {dimension_semantics = [], scalar_prefetch = 0 : i64, scratch_operands = 0 : i64, tpu.core_type = #tpu.core_type<tc>} {
    %c0 = arith.constant 0 : index
    %c0_0 = arith.constant 0 : index
    %0 = vector.load %arg0[%c0, %c0_0] : memref<12x32xf32, #tpu.memory_space<vmem>>, vector<12x32xf32>
    %c0_1 = arith.constant 0 : index
    %c0_2 = arith.constant 0 : index
    %1 = vector.load %arg1[%c0_1, %c0_2] : memref<32x8xf32, #tpu.memory_space<vmem>>, vector<32x8xf32>
    %cst = arith.constant dense<0.000000e+00> : vector<12x8xf32>
    %2 = tpu.matmul %0, %1, %cst {dimension_numbers = #tpu.dot_dimension_numbers<[1], [0], [0], [1], [0, 0, 1, 1], [], []>} : vector<12x32xf32>, vector<32x8xf32>, vector<12x8xf32> -> vector<12x8xf32>
    %c0_3 = arith.constant 0 : index
    %c0_4 = arith.constant 0 : index
    %3 = vector.load %arg2[%c0_3, %c0_4] : memref<12x1xf32, #tpu.memory_space<vmem>>, vector<12x1xf32>
    %4 = vector.broadcast %3 : vector<12x1xf32> to vector<12x8xf32>
    %5 = arith.addf %2, %4 : vector<12x8xf32>
    %c0_5 = arith.constant 0 : index
    %c0_6 = arith.constant 0 : index
    %6 = vector.load %arg4[%c0_5, %c0_6] : memref<12x8xf32, #tpu.memory_space<vmem>>, vector<12x8xf32>
    tpu.vector_store %arg4[%c0_5, %c0_6], %5 {strides = array<i32>} : memref<12x8xf32, #tpu.memory_space<vmem>>, vector<12x8xf32>,
    %c0_7 = arith.constant 0 : index
    %c0_8 = arith.constant 0 : index
    %7 = vector.load %arg3[%c0_7, %c0_8] : memref<12x8xf32, #tpu.memory_space<vmem>>, vector<12x8xf32>
    %8 = arith.subf %5, %7 : vector<12x8xf32>
    %9 = arith.mulf %8, %8 : vector<12x8xf32>
    %10 = vector.shape_cast %9 : vector<12x8xf32> to vector<1x12x8xf32>
    %cst_9 = arith.constant dense<0.000000e+00> : vector<1xf32>
    %11 = vector.multi_reduction <add>, %10, %cst_9 [1, 2] : vector<1x12x8xf32> to vector<1xf32>
    %12 = vector.shape_cast %11 : vector<1xf32> to vector<1x1x1xf32>
    %13 = vector.extract %12[0, 0, 0] : f32 from vector<1x1x1xf32>
    %14 = vector.broadcast %13 : f32 to vector<1x1xf32>
    %c0_10 = arith.constant 0 : index
    %c0_11 = arith.constant 0 : index
    %15 = vector.load %arg5[%c0_10, %c0_11] : memref<1x1xf32, #tpu.memory_space<vmem>>, vector<1x1xf32>
    tpu.vector_store %arg5[%c0_10, %c0_11], %14 {strides = array<i32>} : memref<1x1xf32, #tpu.memory_space<vmem>>, vector<1x1xf32>,
    return
  }
}

</mosaic_0001>

<bundles_post_ra>
// kernel: tpu_custom_call.1
= control target key start
LH: loop header
LB: loop body
LE: loop exit
PB: predicated region body
PF: predicated region fallthrough
CT: control target
= control target key end

     0   :  { %vm38_vm0 = vcmask 261120   ;;  %v209_v3 = vmov 0   ;;  %s282_s0 = inlined_call_operand.vmem [shape: f32[12,32], index: 0, kind: input, shape index: {}]   ;;  %s283_s1 = inlined_call_operand.vmem [shape: f32[32,8], index: 1, kind: input, shape index: {}]   ;;  %s284_s2 = inlined_call_operand.vmem [shape: f32[12,1], index: 2, kind: input, shape index: {}]   ;;  %s285_s3 = inlined_call_operand.vmem [shape: f32[12,8], index: 3, kind: input, shape index: {}]   ;;  %s286_s4 = inlined_call_operand.vmem [shape: f32[12,8], index: 4, kind: output, shape index: {0}]   ;;  %s287_s5 = inlined_call_operand.hbm [shape: f32[1,1], index: 5, kind: output, shape index: {1}]  }
   0x1   :  { %v25_v0 = vld [vmem:[%s283_s1 + $0x18] sm:$0xff]  ;;  %v24_v1 = vld [vmem:[%s283_s1 + $0x10] sm:$0xff]  ;;  %v20_v2 = vld [vmem:[%s282_s0] sm:$0xff]  ;;  %186 = vset.pattern.permute.xlu0 %v209_v3 }
   0x2   :  { %171 = vmatprep.subr.mxu0 %v25_v0  ;;  %v23_v4 = vld [vmem:[%s283_s1 + $0x8] sm:$0xff]  ;;  %179 = vmatprep.mubr.msk.f32.mxu0 %vm38_vm0, %v20_v2  ;;  %v26_v5 = vld [vmem:[%s284_s2] sm:$0xff] }
   0x3   :  { %172 = vmatpush3.msra.mxu0 %v25_v0 }
   0x4   :  { %11 = vsyncpa [#allocation3], 0  ;;  %173 = vmatprep.subr.mxu0 %v24_v1  ;;  %30 = vperm.xlu0 %186, %v26_v5   ;;  %v22_v6 = vld [vmem:[%s283_s1] sm:$0xff]  ;;  %v27_v7 = vld [vmem:[%s284_s2 + $0x8] sm:$0xf]  ;;  %vm122_vm1 = vcmask 60416  }
   0x5   :  { %174 = vmatpush3.msra.mxu0 %v24_v1  ;;  %v21_v8 = vld [vmem:[%s282_s0 + $0x8] sm:$0xf]  ;;  %v124_v15 = vld [vmem:[%s285_s3] sm:$0xff]  ;;  %vm120_vm2 = vcmask 64512   ;;  %vm143_vm3 = vcmask 0  }
   0x6   :  { %175 = vmatprep.subr.mxu0 %v23_v4  ;;  %v125_v12 = vld [vmem:[%s285_s3 + $0x8] sm:$0xf]  ;;  %s210_s3 = smov [#allocation2]  }
   0x7   :  { %176 = vmatpush3.msra.mxu0 %v23_v4  ;;  %s153_s14 = sshll.u32 %s210_s3, 4  ;;  %s154_s14 = int_to_ptr.vmem [resolvable:$true] %s153_s14 }
   0x8   :  { %177 = vmatprep.subr.mxu0 %v22_v6  ;;  %35 = vperm.xlu0 %186, %v27_v7   ;;  %s191_s16 = scalar_lea.vmem %s154_s14, 32  ;;  %p192_p1 = scmp.lt.s32.totalorder %s154_s14, %s154_s14 }
   0x9   :  { %178 = vmatpush3.msra.mxu0 %v22_v6 }
   0xa   :  { %180 = vmatmul.mubr.msk.f32.vlgmr.msra.gmra.mxu0 %vm38_vm0, %v21_v8 }
  0x7f   :  { %v31_v9 = vpop.permute.xlu0 %30 }
  0x83   :  { %v36_v10 = vpop.permute.xlu0 %35 }
  0xca   :  { %v181_v11 = vpop.f32.mrf.mxu0 }
  0xcb   :  { %v117_v13 = vadd.f32 %v181_v11, %v36_v10 }
  0xcc   :  { %v111_v14 = vpop.f32.mrf.mxu0 }
  0xcd   :  { %v127_v16 = vsub.f32 %v117_v13, %v125_v12  ;;  %v112_v17 = vadd.f32 %v111_v14, %v31_v9  ;;  %123 = vst.msk [vmem:[%s286_s4 + $0x8] sm:$0xf] %vm122_vm1, %v117_v13 }
  0xcf   :  { %v126_v18 = vsub.f32 %v112_v17, %v124_v15  ;;  %v129_v19 = vmul.f32 %v127_v16, %v127_v16  ;;  %121 = vst.msk [vmem:[%s286_s4] sm:$0xff] %vm120_vm2, %v112_v17  ;;  %s187_s4 = scalar_lea.vmem %s154_s14, 16 }
  0xd0   :  { %p188_p0 = scmp.ne.s32.totalorder %s154_s14, %s187_s4  ;;  %p193_p2 = scmp.lt.s32.totalorder %s191_s16, %s187_s4 }
  0xd1   :  { %v128_v20 = vmul.f32 %v126_v18, %v126_v18  ;;  %v131_v22 = vsel %vm122_vm1, %v129_v19, 0.0 }
  0xd2   :  { %p194_p3 = por %p193_p2, %p192_p1 }
  0xd3   :  { %v130_v21 = vsel %vm120_vm2, %v128_v20, 0.0 }
  0xd4   :  { %v132_v23 = vadd.f32 %v131_v22, %v130_v21  ;;  %p195_p4 = pnand %p194_p3, %p188_p0 }
  0xd6   :  { %133 = vadd.xlane.f32.xlu1 %v132_v23 }
 0x15f   :  { %v134_v24 = vpop.xlane.xlu1 %133 }
 0x160   :  { %v135_v25 = vrot.slane %v134_v24, 4 }
 0x162   :  { %v136_v26 = vadd.f32 %v135_v25, %v134_v24 }
 0x164   :  { %v137_v27 = vrot.slane %v136_v26, 2 }
 0x166   :  { %v138_v28 = vadd.f32 %v137_v27, %v136_v26 }
 0x168   :  { %v139_v29 = vrot.slane %v138_v28, 1 }
 0x16a   :  { %v140_v30 = vadd.f32 %v139_v29, %v138_v28 }
 0x16c   :  { %182 = vpush %v140_v30 }
 0x19d   :  { %s183_s15 = spop %182 }
 0x19e   :  { %v142_v31 = vstv %s183_s15 }
 0x19f   :  { %144 = vst.msk [vmem:[#allocation2] sm:$0x1] %vm143_vm3, %v142_v31 }
 0x1a0   :  { %198 = shalt.err (!%p195_p4)
}
 0x1a1   :  { %156 = dma.vmem_to_hbm [thread:$0]  %s154_s14, 16, %s287_s5, [#allocation3]  }
 0x1a2   :  { %207 = dma.done.wait [#allocation3], 16  }
 0x1a3   :  { %208 = vsyncadd [#allocation3], 4294967280 }
 0x1a4   :  { %162 = vsyncpa [#allocation3], 1 }

</bundles_post_ra>
